<compile_context>
chip_gen: v7x
topology: tpu7x:2x2x1
jax: 0.10.0
libtpu: 0.0.40
codegen_flags: <defaults>
</compile_context>

<pallas_src>
import jax
import jax.numpy as jnp
from jax import lax
from jax.experimental import pallas as pl
from jax.experimental.pallas import tpu as pltpu


_PREFERRED_CHUNK = 512  # lane-chunk width of the in-kernel loop (vreg-resident)


def _round_up(n, m):
    return ((n + m - 1) // m) * m


def _pick_chunk(tb):
    """Largest lane chunk (multiple of 128, <= 512) dividing the batch tile."""
    if tb <= _PREFERRED_CHUNK:
        return tb
    for c in (512, 384, 256, 128):
        if tb % c == 0:
            return c
    return tb  # unreachable: TB is always a multiple of 128


def generator_kernel(x_ref,
                     w0_ref, b0_ref,
                     w1_ref, b1_ref,
                     w2_ref, b2_ref,
                     w3_ref, b3_ref,
                     o_ref):
    """One batch tile of the 4-layer MLP in feature-major (F, TB) layout.

    Weights are PyTorch-layout (out, in); biases are (out, 1) columns, so each
    layer is `W @ x + b`.  The batch rides the lane axis; the tile is processed
    in vreg-sized lane chunks so intermediates never spill to VMEM.
    """
    # Hoist VMEM-resident weights/biases out of the chunk loop.
    w0, b0 = w0_ref[...], b0_ref[...]
    w1, b1 = w1_ref[...], b1_ref[...]
    w2, b2 = w2_ref[...], b2_ref[...]
    w3, b3 = w3_ref[...], b3_ref[...]

    tb = x_ref.shape[-1]
    chunk = _pick_chunk(tb)
    n_chunks = tb // chunk

    def one_chunk(ci, carry):
        col = pl.multiple_of(ci * chunk, 128)
        x = x_ref[:, pl.ds(col, chunk)].astype(jnp.float32)      # (11, C)

        # fn: Linear(11, 32) + ReLU
        h = jnp.dot(w0, x, preferred_element_type=jnp.float32) + b0
        h = jnp.maximum(h, 0.0)                                   # (32, C)
        # fn1: Linear(32, 64) + ReLU
        h = jnp.dot(w1, h, preferred_element_type=jnp.float32) + b1
        h = jnp.maximum(h, 0.0)                                   # (64, C)
        # fn2: Linear(64, 32) + ReLU
        h = jnp.dot(w2, h, preferred_element_type=jnp.float32) + b2
        h = jnp.maximum(h, 0.0)                                   # (32, C)
        # fn3: Linear(32, 11) + Sigmoid (exp + approx reciprocal both on EUP)
        z = jnp.dot(w3, h, preferred_element_type=jnp.float32) + b3
        y = pl.reciprocal(1.0 + jnp.exp(-z), approx=True)         # (11, C)

        o_ref[:, pl.ds(col, chunk)] = y.astype(o_ref.dtype)
        return carry

    lax.fori_loop(0, n_chunks, one_chunk, 0,
                  unroll=True if n_chunks <= 16 else 8)


def generator_forward(x, params, *, block_batch=8192, io_dtype=jnp.bfloat16):
    """x: (B, 11) float32.  params: PyTorch-layout weights/biases (see init).

    Returns (B, 11) in x.dtype, same forward semantics as the PyTorch Generator
    (bf16 I/O quantization + approx reciprocal are the only deviations; pass
    io_dtype=jnp.float32 for the tighter path).
    """
    B, F = x.shape
    assert F == 11, "Generator expects 11 input features"
    assert block_batch % 128 == 0

    # Batch-tile size: multiple of 128 lanes.  Mid-sized batches get >= 2 tiles
    # so dimension_semantics=("parallel",) can feed both v7x TensorCores.
    if B > block_batch:
        tb = block_batch
    elif B > 4096:
        tb = _round_up(-(-B // 2), 128)
    else:
        tb = max(128, _round_up(B, 128))
    num_tiles = pl.cdiv(B, tb)

    # Feature-major: batch on the lane axis.  No explicit padding -- Pallas
    # masks the ragged last tile; its garbage lanes feed only discarded output.
    x_t = x.astype(io_dtype).T                                    # (11, B)

    w_args = (params["w0"], params["b0"],
              params["w1"], params["b1"],
              params["w2"], params["b2"],
              params["w3"], params["b3"])

    # x/out streamed per batch tile; weights/biases full-extent, constant index
    # -> DMA'd once and VMEM-resident for the whole grid.
    in_specs = [pl.BlockSpec((11, tb), lambda i: (0, i))]
    in_specs += [pl.BlockSpec(p.shape, lambda i: (0, 0)) for p in w_args]
    out_spec = pl.BlockSpec((11, tb), lambda i: (0, i))

    # Scoped-VMEM budget: double-buffered x+out tiles + weights + margin,
    # clamped to [16 MiB, 32 MiB] (safe on v5e/v6e/v7x).
    itemsize = jnp.dtype(io_dtype).itemsize
    io_block_bytes = 2 * 2 * 11 * tb * itemsize
    weight_bytes = sum(int(p.size) * p.dtype.itemsize for p in w_args)
    vmem_limit = int(min(32 << 20,
                         max(16 << 20, io_block_bytes + weight_bytes + (8 << 20))))

    out_t = pl.pallas_call(
        generator_kernel,
        out_shape=jax.ShapeDtypeStruct((11, B), io_dtype),
        grid=(num_tiles,),
        in_specs=in_specs,
        out_specs=out_spec,
        compiler_params=pltpu.CompilerParams(
            dimension_semantics=("parallel",),   # shards batch across TCs on v7x
            vmem_limit_bytes=vmem_limit,
        ),
    )(x_t, *w_args)

    # Back to (B, 11); transpose + dtype cast fuse into one XLA copy.
    return out_t.T.astype(x.dtype)


def init_params(key):
    """Deterministic init mimicking PyTorch's default Linear init:
    U(-1/sqrt(fan_in), 1/sqrt(fan_in)) for both weight and bias.
    Weights in PyTorch layout (out_features, in_features); biases (out, 1)."""
    dims = [(11, 32), (32, 64), (64, 32), (32, 11)]
    params = {}
    keys = jax.random.split(key, 2 * len(dims))
    for i, (fan_in, fan_out) in enumerate(dims):
        k = 1.0 / jnp.sqrt(jnp.float32(fan_in))
        params[f"w{i}"] = jax.random.uniform(keys[2 * i], (fan_out, fan_in),
                                             minval=-k, maxval=k, dtype=jnp.float32)
        params[f"b{i}"] = jax.random.uniform(keys[2 * i + 1], (fan_out, 1),
                                             minval=-k, maxval=k, dtype=jnp.float32)
    return params


def reference_forward(x, params):
    """Plain-JAX f32 reference of the same MLP (batch-major layout)."""
    h = jnp.maximum(x @ params["w0"].T + params["b0"].T, 0.0)
    h = jnp.maximum(h @ params["w1"].T + params["b1"].T, 0.0)
    h = jnp.maximum(h @ params["w2"].T + params["b2"].T, 0.0)
    z = h @ params["w3"].T + params["b3"].T
    return 1.0 / (1.0 + jnp.exp(-z))


if __name__ == "__main__":
    key = jax.random.PRNGKey(0)
    pkey, xkey, xkey2 = jax.random.split(key, 3)

    params = init_params(pkey)

    # 1) f32-I/O path, single (ragged) tile: near-exact vs reference
    #    (only deviation: approx EUP reciprocal in the sigmoid, ~1e-3).
    batch = 8
    x = jax.random.normal(xkey, (batch, 11), dtype=jnp.float32)
    out = jax.block_until_ready(generator_forward(x, params, io_dtype=jnp.float32))
    ref = reference_forward(x, params)
    assert out.shape == (batch, 11)
    assert jnp.allclose(out, ref, atol=5e-3, rtol=0.0)

    # 2) Default bf16-I/O path, multi-tile grid with a ragged last block
    #    (600 = 2*256 + 88): exercises the masked-edge handling.
    batch2 = 600
    x2 = jax.random.normal(xkey2, (batch2, 11), dtype=jnp.float32)
    out2 = jax.block_until_ready(generator_forward(x2, params, block_batch=256))
    ref2 = reference_forward(x2, params)
    assert out2.shape == (batch2, 11)
    assert jnp.allclose(out2, ref2, atol=5e-2, rtol=0.0)

    print("KERNEL_OK")
</pallas_src>

<mosaic_0001>
module attributes {stable_mosaic.version = 11 : i64} {
  func.func @generator_kernel(%arg0: i32, %arg1: memref<11x128xf32, #tpu.memory_space<vmem>>, %arg2: memref<32x11xf32, #tpu.memory_space<vmem>>, %arg3: memref<32x1xf32, #tpu.memory_space<vmem>>, %arg4: memref<64x32xf32, #tpu.memory_space<vmem>>, %arg5: memref<64x1xf32, #tpu.memory_space<vmem>>, %arg6: memref<32x64xf32, #tpu.memory_space<vmem>>, %arg7: memref<32x1xf32, #tpu.memory_space<vmem>>, %arg8: memref<11x32xf32, #tpu.memory_space<vmem>>, %arg9: memref<11x1xf32, #tpu.memory_space<vmem>>, %arg10: memref<11x128xf32, #tpu.memory_space<vmem>>) attributes {dimension_semantics = [#tpu.dimension_semantics<parallel>], iteration_bounds = array<i64: 1>, scalar_prefetch = 0 : i64, scratch_operands = 0 : i64, tpu.core_type = #tpu.core_type<tc>, window_params = [{transform_indices = @transform_0, window_bounds = array<i64: 11, 128>}, {pipeline_mode = #tpu.pipeline_mode<synchronous>, transform_indices = @transform_1, window_bounds = array<i64: 32, 11>}, {pipeline_mode = #tpu.pipeline_mode<synchronous>, transform_indices = @transform_2, window_bounds = array<i64: 32, 1>}, {pipeline_mode = #tpu.pipeline_mode<synchronous>, transform_indices = @transform_3, window_bounds = array<i64: 64, 32>}, {pipeline_mode = #tpu.pipeline_mode<synchronous>, transform_indices = @transform_4, window_bounds = array<i64: 64, 1>}, {pipeline_mode = #tpu.pipeline_mode<synchronous>, transform_indices = @transform_5, window_bounds = array<i64: 32, 64>}, {pipeline_mode = #tpu.pipeline_mode<synchronous>, transform_indices = @transform_6, window_bounds = array<i64: 32, 1>}, {pipeline_mode = #tpu.pipeline_mode<synchronous>, transform_indices = @transform_7, window_bounds = array<i64: 11, 32>}, {pipeline_mode = #tpu.pipeline_mode<synchronous>, transform_indices = @transform_8, window_bounds = array<i64: 11, 1>}, {transform_indices = @transform_9, window_bounds = array<i64: 11, 128>}]} {
    %c0 = arith.constant 0 : index
    %c0_0 = arith.constant 0 : index
    %0 = vector.load %arg2[%c0, %c0_0] : memref<32x11xf32, #tpu.memory_space<vmem>>, vector<32x11xf32>
    %c0_1 = arith.constant 0 : index
    %c0_2 = arith.constant 0 : index
    %1 = vector.load %arg3[%c0_1, %c0_2] : memref<32x1xf32, #tpu.memory_space<vmem>>, vector<32x1xf32>
    %c0_3 = arith.constant 0 : index
    %c0_4 = arith.constant 0 : index
    %2 = vector.load %arg4[%c0_3, %c0_4] : memref<64x32xf32, #tpu.memory_space<vmem>>, vector<64x32xf32>
    %c0_5 = arith.constant 0 : index
    %c0_6 = arith.constant 0 : index
    %3 = vector.load %arg5[%c0_5, %c0_6] : memref<64x1xf32, #tpu.memory_space<vmem>>, vector<64x1xf32>
    %c0_7 = arith.constant 0 : index
    %c0_8 = arith.constant 0 : index
    %4 = vector.load %arg6[%c0_7, %c0_8] : memref<32x64xf32, #tpu.memory_space<vmem>>, vector<32x64xf32>
    %c0_9 = arith.constant 0 : index
    %c0_10 = arith.constant 0 : index
    %5 = vector.load %arg7[%c0_9, %c0_10] : memref<32x1xf32, #tpu.memory_space<vmem>>, vector<32x1xf32>
    %c0_11 = arith.constant 0 : index
    %c0_12 = arith.constant 0 : index
    %6 = vector.load %arg8[%c0_11, %c0_12] : memref<11x32xf32, #tpu.memory_space<vmem>>, vector<11x32xf32>
    %c0_13 = arith.constant 0 : index
    %c0_14 = arith.constant 0 : index
    %7 = vector.load %arg9[%c0_13, %c0_14] : memref<11x1xf32, #tpu.memory_space<vmem>>, vector<11x1xf32>
    %c0_i32 = arith.constant 0 : i32
    %c128_i32 = arith.constant 128 : i32
    %8 = arith.muli %c0_i32, %c128_i32 : i32
    %9 = tpu.assume_multiple %8, 128 : i32
    %c0_15 = arith.constant 0 : index
    %10 = arith.index_cast %9 : i32 to index
    %11 = vector.load %arg1[%c0_15, %10] : memref<11x128xf32, #tpu.memory_space<vmem>>, vector<11x128xf32>
    %cst = arith.constant dense<0.000000e+00> : vector<32x128xf32>
    %12 = tpu.matmul %0, %11, %cst {dimension_numbers = #tpu.dot_dimension_numbers<[1], [0], [0], [1], [0, 0, 1, 1], [], []>} : vector<32x11xf32>, vector<11x128xf32>, vector<32x128xf32> -> vector<32x128xf32>
    %13 = vector.broadcast %1 : vector<32x1xf32> to vector<32x128xf32>
    %14 = arith.addf %12, %13 : vector<32x128xf32>
    %cst_16 = arith.constant 0.000000e+00 : f32
    %15 = vector.broadcast %cst_16 : f32 to vector<32x128xf32>
    %16 = arith.maximumf %14, %15 : vector<32x128xf32>
    %cst_17 = arith.constant dense<0.000000e+00> : vector<64x128xf32>
    %17 = tpu.matmul %2, %16, %cst_17 {dimension_numbers = #tpu.dot_dimension_numbers<[1], [0], [0], [1], [0, 0, 1, 1], [], []>} : vector<64x32xf32>, vector<32x128xf32>, vector<64x128xf32> -> vector<64x128xf32>
    %18 = vector.broadcast %3 : vector<64x1xf32> to vector<64x128xf32>
    %19 = arith.addf %17, %18 : vector<64x128xf32>
    %cst_18 = arith.constant 0.000000e+00 : f32
    %20 = vector.broadcast %cst_18 : f32 to vector<64x128xf32>
    %21 = arith.maximumf %19, %20 : vector<64x128xf32>
    %cst_19 = arith.constant dense<0.000000e+00> : vector<32x128xf32>
    %22 = tpu.matmul %4, %21, %cst_19 {dimension_numbers = #tpu.dot_dimension_numbers<[1], [0], [0], [1], [0, 0, 1, 1], [], []>} : vector<32x64xf32>, vector<64x128xf32>, vector<32x128xf32> -> vector<32x128xf32>
    %23 = vector.broadcast %5 : vector<32x1xf32> to vector<32x128xf32>
    %24 = arith.addf %22, %23 : vector<32x128xf32>
    %cst_20 = arith.constant 0.000000e+00 : f32
    %25 = vector.broadcast %cst_20 : f32 to vector<32x128xf32>
    %26 = arith.maximumf %24, %25 : vector<32x128xf32>
    %cst_21 = arith.constant dense<0.000000e+00> : vector<11x128xf32>
    %27 = tpu.matmul %6, %26, %cst_21 {dimension_numbers = #tpu.dot_dimension_numbers<[1], [0], [0], [1], [0, 0, 1, 1], [], []>} : vector<11x32xf32>, vector<32x128xf32>, vector<11x128xf32> -> vector<11x128xf32>
    %28 = vector.broadcast %7 : vector<11x1xf32> to vector<11x128xf32>
    %29 = arith.addf %27, %28 : vector<11x128xf32>
    %cst_22 = arith.constant 0.000000e+00 : f32
    %30 = vector.broadcast %cst_22 : f32 to vector<11x128xf32>
    %31 = arith.subf %30, %29 : vector<11x128xf32>
    %32 = math.exp %31 : vector<11x128xf32>
    %cst_23 = arith.constant 1.000000e+00 : f32
    %33 = vector.broadcast %cst_23 : f32 to vector<11x128xf32>
    %34 = arith.addf %33, %32 : vector<11x128xf32>
    %35 = tpu.reciprocal %34 {approx = true} : vector<11x128xf32> -> vector<11x128xf32>
    %c0_24 = arith.constant 0 : index
    %36 = arith.index_cast %9 : i32 to index
    %37 = vector.load %arg10[%c0_24, %36] : memref<11x128xf32, #tpu.memory_space<vmem>>, vector<11x128xf32>
    tpu.vector_store %arg10[%c0_24, %36], %35 {strides = array<i32>} : memref<11x128xf32, #tpu.memory_space<vmem>>, vector<11x128xf32>,
    %c1_i32 = arith.constant 1 : i32
    return
  }
  func.func @transform_0(%arg0: i32) -> (i32, i32) {
    %c0_i32 = arith.constant 0 : i32
    %c0_i32_0 = arith.constant 0 : i32
    return %c0_i32, %arg0 : i32, i32
  }
  func.func @transform_1(%arg0: i32) -> (i32, i32) {
    %c0_i32 = arith.constant 0 : i32
    %c0_i32_0 = arith.constant 0 : i32
    %c0_i32_1 = arith.constant 0 : i32
    return %c0_i32, %c0_i32_0 : i32, i32
  }
  func.func @transform_2(%arg0: i32) -> (i32, i32) {
    %c0_i32 = arith.constant 0 : i32
    %c0_i32_0 = arith.constant 0 : i32
    %c0_i32_1 = arith.constant 0 : i32
    return %c0_i32, %c0_i32_0 : i32, i32
  }
  func.func @transform_3(%arg0: i32) -> (i32, i32) {
    %c0_i32 = arith.constant 0 : i32
    %c0_i32_0 = arith.constant 0 : i32
    %c0_i32_1 = arith.constant 0 : i32
    return %c0_i32, %c0_i32_0 : i32, i32
  }
  func.func @transform_4(%arg0: i32) -> (i32, i32) {
    %c0_i32 = arith.constant 0 : i32
    %c0_i32_0 = arith.constant 0 : i32
    %c0_i32_1 = arith.constant 0 : i32
    return %c0_i32, %c0_i32_0 : i32, i32
  }
  func.func @transform_5(%arg0: i32) -> (i32, i32) {
    %c0_i32 = arith.constant 0 : i32
    %c0_i32_0 = arith.constant 0 : i32
    %c0_i32_1 = arith.constant 0 : i32
    return %c0_i32, %c0_i32_0 : i32, i32
  }
  func.func @transform_6(%arg0: i32) -> (i32, i32) {
    %c0_i32 = arith.constant 0 : i32
    %c0_i32_0 = arith.constant 0 : i32
    %c0_i32_1 = arith.constant 0 : i32
    return %c0_i32, %c0_i32_0 : i32, i32
  }
  func.func @transform_7(%arg0: i32) -> (i32, i32) {
    %c0_i32 = arith.constant 0 : i32
    %c0_i32_0 = arith.constant 0 : i32
    %c0_i32_1 = arith.constant 0 : i32
    return %c0_i32, %c0_i32_0 : i32, i32
  }
  func.func @transform_8(%arg0: i32) -> (i32, i32) {
    %c0_i32 = arith.constant 0 : i32
    %c0_i32_0 = arith.constant 0 : i32
    %c0_i32_1 = arith.constant 0 : i32
    return %c0_i32, %c0_i32_0 : i32, i32
  }
  func.func @transform_9(%arg0: i32) -> (i32, i32) {
    %c0_i32 = arith.constant 0 : i32
    %c0_i32_0 = arith.constant 0 : i32
    return %c0_i32, %arg0 : i32, i32
  }
}

</mosaic_0001>

<bundles_post_ra>
// kernel: tpu_custom_call.1
= control target key start
LH: loop header
LB: loop body
LE: loop exit
PB: predicated region body
PF: predicated region fallthrough
CT: control target
= control target key end

     0   :  { %vm103_vm0 = vcmask 1042432   ;;  %vm90_vm1 = vcmask 89088   ;;  %vm771_vm2 = vmmov 1   ;;  %v772_v2 = vmov 0   ;;  %s961_s0 = inlined_call_operand.vmem [shape: f32[11,8], index: 0, kind: input, shape index: {}]   ;;  %s962_s1 = inlined_call_operand.vmem [shape: f32[32,11], index: 1, kind: input, shape index: {}]   ;;  %s963_s2 = inlined_call_operand.vmem [shape: f32[32,1], index: 2, kind: input, shape index: {}]   ;;  %s964_s4 = inlined_call_operand.vmem [shape: f32[64,1], index: 4, kind: input, shape index: {}]   ;;  %s965_s6 = inlined_call_operand.vmem [shape: f32[32,1], index: 6, kind: input, shape index: {}]   ;;  %s966_s8 = inlined_call_operand.vmem [shape: f32[11,1], index: 8, kind: input, shape index: {}]   ;;  %s967_s3 = inlined_call_operand.vmem [shape: f32[64,32], index: 3, kind: input, shape index: {}]   ;;  %s968_s5 = inlined_call_operand.vmem [shape: f32[32,64], index: 5, kind: input, shape index: {}]   ;;  %s969_s7 = inlined_call_operand.vmem [shape: f32[11,32], index: 7, kind: input, shape index: {}]   ;;  %s970_s9 = inlined_call_operand.vmem [shape: f32[11,8], index: 9, kind: output, shape index: {}]  }
   0x1   :  { %v68_v0 = vld [vmem:[%s961_s0] sm:$0xff]  ;;  %v69_v1 = vld [vmem:[%s961_s0 + $0x8] sm:$0x7]  ;;  %vm722_vm3 = vmpackc.low %vm103_vm0, %vm771_vm2  ;;  %761 = vset.pattern.permute.xlu0 %v772_v2  ;;  %762 = vset.pattern.permute.xlu1 %v772_v2  ;;  %vm236_vm4 = vcmask 261120   ;;  %vm394_vm5 = vcmask 523264  }
   0x2   :  { %v721_v3 = vpack.c.bf16 %v69_v1, %v68_v0  ;;  %v32_v4 = vld [vmem:[%s962_s1] sm:$0xff]  ;;  %v38_v6 = vld [vmem:[%s963_s2 + $0x10] sm:$0xff]  ;;  %v33_v7 = vld [vmem:[%s962_s1 + $0x8] sm:$0xff] }
   0x3   :  { %662 = vmatprep.mubr.msk.f32.mxu0 %vm90_vm1, %v32_v4  ;;  %v36_v5 = vld [vmem:[%s963_s2] sm:$0xff]  ;;  %82 = vperm.xlu1 %762, %v38_v6   ;;  %v37_v8 = vld [vmem:[%s963_s2 + $0x8] sm:$0xff]  ;;  %v34_v9 = vld [vmem:[%s962_s1 + $0x10] sm:$0xff] }
   0x4   :  { %723 = vmatprep.subr.msk.bf16.mxu0 %vm722_vm3, %v721_v3  ;;  %72 = vperm.xlu0 %761, %v36_v5   ;;  %v39_v10 = vld [vmem:[%s963_s2 + $0x18] sm:$0xff]  ;;  %v48_v12 = vld [vmem:[%s964_s4] sm:$0xff]  ;;  %v49_v13 = vld [vmem:[%s964_s4 + $0x8] sm:$0xff] }
   0x5   :  { %726 = vmatpush3.bf16.msk.msra.mxu0 %vm722_vm3, %v721_v3  ;;  %v35_v11 = vld [vmem:[%s962_s1 + $0x18] sm:$0xff]  ;;  %v50_v14 = vld [vmem:[%s964_s4 + $0x10] sm:$0xff]  ;;  %v52_v16 = vld [vmem:[%s964_s4 + $0x20] sm:$0xff] }
   0x6   :  { %v51_v15 = vld [vmem:[%s964_s4 + $0x18] sm:$0xff]  ;;  %v53_v17 = vld [vmem:[%s964_s4 + $0x28] sm:$0xff]  ;;  %v54_v18 = vld [vmem:[%s964_s4 + $0x30] sm:$0xff] }
   0x7   :  { %87 = vperm.xlu1 %762, %v39_v10   ;;  %v55_v19 = vld [vmem:[%s964_s4 + $0x38] sm:$0xff]  ;;  %v60_v20 = vld [vmem:[%s965_s6] sm:$0xff]  ;;  %v61_v21 = vld [vmem:[%s965_s6 + $0x8] sm:$0xff] }
   0x8   :  { %663 = vmatmul.mubr.msk.f32.vlgmr.msra.gmra.mrb[0].mxu0 %vm90_vm1, %v33_v7  ;;  %77 = vperm.xlu0 %761, %v37_v8   ;;  %v62_v22 = vld [vmem:[%s965_s6 + $0x10] sm:$0xff]  ;;  %v63_v23 = vld [vmem:[%s965_s6 + $0x18] sm:$0xff]  ;;  %v66_v24 = vld [vmem:[%s966_s8] sm:$0xff] }
   0x9   :  { %665 = vmatprep.mubr.msk.f32.mxu0 %vm90_vm1, %v34_v9  ;;  %v67_v25 = vld [vmem:[%s966_s8 + $0x8] sm:$0x7]  ;;  %v40_v26 = vld [vmem:[%s967_s3] sm:$0xff]  ;;  %v42_v46 = vld [vmem:[%s967_s3 + $0x10] sm:$0xff] }
   0xa   :  { %676 = vmatprep.mubr.msk.f32.mxu1 %vm236_vm4, %v40_v26  ;;  %v41_v45 = vld [vmem:[%s967_s3 + $0x8] sm:$0xff]  ;;  %v43_v47 = vld [vmem:[%s967_s3 + $0x18] sm:$0xff]  ;;  %v44_v48 = vld [vmem:[%s967_s3 + $0x20] sm:$0xff] }
   0xb   :  { %203 = vperm.xlu1 %762, %v49_v13   ;;  %v45_v49 = vld [vmem:[%s967_s3 + $0x28] sm:$0xff]  ;;  %v46_v50 = vld [vmem:[%s967_s3 + $0x30] sm:$0xff]  ;;  %v47_v51 = vld [vmem:[%s967_s3 + $0x38] sm:$0xff] }
   0xc   :  { %666 = vmatmul.mubr.msk.f32.gmra.mrb[2].mxu0 %vm90_vm1, %v35_v11  ;;  %198 = vperm.xlu0 %761, %v48_v12   ;;  %v56_v52 = vld [vmem:[%s968_s5] sm:$0xff]  ;;  %v58_v26 = vld [vmem:[%s968_s5 + $0x10] sm:$0xff] }
   0xd   :  { %704 = vmatprep.mubr.msk.f32.mxu0 %vm394_vm5, %v56_v52 }
   0xf   :  { %213 = vperm.xlu1 %762, %v51_v15  }
  0x10   :  { %208 = vperm.xlu0 %761, %v50_v14  }
  0x13   :  { %223 = vperm.xlu1 %762, %v53_v17  }
  0x14   :  { %218 = vperm.xlu0 %761, %v52_v16  }
  0x17   :  { %233 = vperm.xlu1 %762, %v55_v19  }
  0x18   :  { %228 = vperm.xlu0 %761, %v54_v18  }
  0x1b   :  { %381 = vperm.xlu1 %762, %v61_v21  }
  0x1c   :  { %376 = vperm.xlu0 %761, %v60_v20  }
  0x1f   :  { %391 = vperm.xlu1 %762, %v63_v23  }
  0x20   :  { %386 = vperm.xlu0 %761, %v62_v22  }
  0x23   :  { %503 = vperm.xlu1 %762, %v67_v25   ;;  %v57_v25 = vld [vmem:[%s968_s5 + $0x8] sm:$0xff] }
  0x24   :  { %498 = vperm.xlu0 %761, %v66_v24  }
  0x82   :  { %v83_v28 = vpop.permute.xlu1 %82 }
  0x83   :  { %v73_v27 = vpop.permute.xlu0 %72 }
  0x86   :  { %v88_v35 = vpop.permute.xlu1 %87 }
  0x87   :  { %v78_v29 = vpop.permute.xlu0 %77 }
  0x8a   :  { %v204_v53 = vpop.permute.xlu1 %203 }
  0x8b   :  { %v199_v54 = vpop.permute.xlu0 %198 }
  0x8e   :  { %v214_v55 = vpop.permute.xlu1 %213 }
  0x8f   :  { %v209_v57 = vpop.permute.xlu0 %208 }
  0x92   :  { %v224_v2 = vpop.permute.xlu1 %223 }
  0x93   :  { %v219_v5 = vpop.permute.xlu0 %218 }
  0x96   :  { %v234_v14 = vpop.permute.xlu1 %233 }
  0x97   :  { %v229_v17 = vpop.permute.xlu0 %228 }
  0xdb   :  { %v664_v30 = vpop.f32.mrb[0].mxu0 }
  0xdc   :  { %v179_v31 = vadd.f32 %v664_v30, %v78_v29  ;;  %v173_v32 = vpop.f32.mrb[1].mxu0  ;;  %v382_v29 = vpop.permute.xlu1 %381 }
  0xdd   :  { %v174_v33 = vadd.f32 %v173_v32, %v73_v27  ;;  %v59_v27 = vld [vmem:[%s968_s5 + $0x18] sm:$0xff]  ;;  %v377_v30 = vpop.permute.xlu0 %376 }
  0xde   :  { %v193_v34 = vmax.f32 %v179_v31, 0.0 }
  0xdf   :  { %v192_v36 = vmax.f32 %v174_v33, 0.0  ;;  %v667_v37 = vpop.f32.mrb[2].mxu0 }
  0xe0   :  { %v189_v38 = vadd.f32 %v667_v37, %v88_v35  ;;  %v183_v39 = vpop.f32.mrb[3].mxu0 }
  0xe1   :  { %v184_v40 = vadd.f32 %v183_v39, %v83_v28  ;;  %v727_v41 = vpack.c.bf16 %v193_v34, %v192_v36  ;;  %v64_v28 = vld [vmem:[%s969_s7] sm:$0xff]  ;;  %v392_v36 = vpop.permute.xlu1 %391  ;;  %v387_v39 = vpop.permute.xlu0 %386 }
  0xe2   :  { %v195_v42 = vmax.f32 %v189_v38, 0.0 }
  0xe3   :  { %v194_v43 = vmax.f32 %v184_v40, 0.0  ;;  %728 = vmatprep.subr.bf16.mxu1 %v727_v41 }
  0xe4   :  { %730 = vmatpush3.bf16.msra.mxu1 %v727_v41 }
  0xe5   :  { %v731_v44 = vpack.c.bf16 %v195_v42, %v194_v43 }
  0xe7   :  { %732 = vmatprep.subr.bf16.mxu1 %v731_v44 }
  0xe8   :  { %734 = vmatpush3.bf16.msra.mxu1 %v731_v44 }
  0xeb   :  { %677 = vmatmul.mubr.msk.f32.vlgmr.msra.gmra.mrb[0].mxu1 %vm236_vm4, %v41_v45 }
  0xec   :  { %679 = vmatprep.mubr.msk.f32.mxu1 %vm236_vm4, %v42_v46 }
  0xef   :  { %680 = vmatmul.mubr.msk.f32.gmra.mrb[2].mxu1 %vm236_vm4, %v43_v47  ;;  %v65_v47 = vld [vmem:[%s969_s7 + $0x8] sm:$0x7] }
  0xf0   :  { %682 = vmatprep.mubr.msk.f32.mxu1 %vm236_vm4, %v44_v48  ;;  %v504_v48 = vpop.permute.xlu1 %503 }
  0xf3   :  { %683 = vmatmul.mubr.msk.f32.gmra.mrb[4].mxu1 %vm236_vm4, %v45_v49 }
  0xf4   :  { %685 = vmatprep.mubr.msk.f32.mxu1 %vm236_vm4, %v46_v50  ;;  %v499_v50 = vpop.permute.xlu0 %498 }
  0xf7   :  { %686 = vmatmul.mubr.msk.f32.gmra.mrb[6].mxu1 %vm236_vm4, %v47_v51 }
  0xf8   :  { %718 = vmatprep.mubr.msk.f32.mxu1 %vm236_vm4, %v64_v28 }
 0x1be   :  { %v678_v56 = vpop.f32.mrb[0].mxu1 }
 0x1bf   :  { %v333_v58 = vadd.f32 %v678_v56, %v204_v53  ;;  %v327_v59 = vpop.f32.mrb[1].mxu1 }
 0x1c0   :  { %v328_v60 = vadd.f32 %v327_v59, %v199_v54 }
 0x1c1   :  { %v367_v61 = vmax.f32 %v333_v58, 0.0 }
 0x1c2   :  { %v366_v62 = vmax.f32 %v328_v60, 0.0  ;;  %v681_v63 = vpop.f32.mrb[2].mxu1 }
 0x1c3   :  { %v343_v0 = vadd.f32 %v681_v63, %v214_v55  ;;  %v337_v1 = vpop.f32.mrb[3].mxu1 }
 0x1c4   :  { %v735_v3 = vpack.c.bf16 %v367_v61, %v366_v62  ;;  %v338_v4 = vadd.f32 %v337_v1, %v209_v57 }
 0x1c5   :  { %v369_v6 = vmax.f32 %v343_v0, 0.0 }
 0x1c6   :  { %v368_v7 = vmax.f32 %v338_v4, 0.0  ;;  %v684_v8 = vpop.f32.mrb[4].mxu1  ;;  %736 = vmatprep.subr.bf16.mxu0 %v735_v3 }
 0x1c7   :  { %v353_v9 = vadd.f32 %v684_v8, %v224_v2  ;;  %v347_v10 = vpop.f32.mrb[5].mxu1  ;;  %738 = vmatpush3.bf16.msra.mxu0 %v735_v3 }
 0x1c8   :  { %v739_v11 = vpack.c.bf16 %v369_v6, %v368_v7  ;;  %v348_v12 = vadd.f32 %v347_v10, %v219_v5 }
 0x1c9   :  { %v371_v13 = vmax.f32 %v353_v9, 0.0 }
 0x1ca   :  { %v370_v15 = vmax.f32 %v348_v12, 0.0  ;;  %v687_v16 = vpop.f32.mrb[6].mxu1  ;;  %740 = vmatprep.subr.bf16.mxu0 %v739_v11 }
 0x1cb   :  { %v363_v18 = vadd.f32 %v687_v16, %v234_v14  ;;  %v357_v19 = vpop.f32.mrb[7].mxu1  ;;  %742 = vmatpush3.bf16.msra.mxu0 %v739_v11 }
 0x1cc   :  { %v743_v20 = vpack.c.bf16 %v371_v13, %v370_v15  ;;  %v358_v21 = vadd.f32 %v357_v19, %v229_v17 }
 0x1cd   :  { %v373_v22 = vmax.f32 %v363_v18, 0.0 }
 0x1ce   :  { %v372_v23 = vmax.f32 %v358_v21, 0.0  ;;  %744 = vmatprep.subr.bf16.mxu0 %v743_v20 }
 0x1cf   :  { %746 = vmatpush3.bf16.msra.mxu0 %v743_v20 }
 0x1d0   :  { %v747_v24 = vpack.c.bf16 %v373_v22, %v372_v23 }
 0x1d2   :  { %748 = vmatprep.subr.bf16.mxu0 %v747_v24 }
 0x1d3   :  { %750 = vmatpush3.bf16.msra.mxu0 %v747_v24 }
 0x1d6   :  { %705 = vmatmul.mubr.msk.f32.vlgmr.msra.gmra.mrb[4].mxu0 %vm394_vm5, %v57_v25 }
 0x1d7   :  { %707 = vmatprep.mubr.msk.f32.mxu0 %vm394_vm5, %v58_v26 }
 0x1da   :  { %708 = vmatmul.mubr.msk.f32.gmra.mrb[6].mxu0 %vm394_vm5, %v59_v27 }
 0x2a9   :  { %v706_v31 = vpop.f32.mrb[4].mxu0 }
 0x2aa   :  { %v479_v32 = vadd.f32 %v706_v31, %v382_v29  ;;  %v473_v33 = vpop.f32.mrb[5].mxu0 }
 0x2ab   :  { %v474_v34 = vadd.f32 %v473_v33, %v377_v30 }
 0x2ac   :  { %v493_v35 = vmax.f32 %v479_v32, 0.0 }
 0x2ad   :  { %v492_v37 = vmax.f32 %v474_v34, 0.0  ;;  %v709_v38 = vpop.f32.mrb[6].mxu0 }
 0x2ae   :  { %v489_v40 = vadd.f32 %v709_v38, %v392_v36  ;;  %v483_v41 = vpop.f32.mrb[7].mxu0 }
 0x2af   :  { %v751_v42 = vpack.c.bf16 %v493_v35, %v492_v37  ;;  %v484_v43 = vadd.f32 %v483_v41, %v387_v39 }
 0x2b0   :  { %v495_v44 = vmax.f32 %v489_v40, 0.0 }
 0x2b1   :  { %v494_v45 = vmax.f32 %v484_v43, 0.0  ;;  %752 = vmatprep.subr.bf16.mxu1 %v751_v42 }
 0x2b2   :  { %754 = vmatpush3.bf16.msra.mxu1 %v751_v42 }
 0x2b3   :  { %v755_v46 = vpack.c.bf16 %v495_v44, %v494_v45 }
 0x2b5   :  { %756 = vmatprep.subr.bf16.mxu1 %v755_v46 }
 0x2b6   :  { %758 = vmatpush3.bf16.msra.mxu1 %v755_v46 }
 0x2b9   :  { %719 = vmatmul.mubr.msk.f32.vlgmr.msra.gmra.mrb[8].mxu1 %vm236_vm4, %v65_v47 }
 0x38c   :  { %v720_v49 = vpop.f32.mrb[8].mxu1 }
 0x38d   :  { %v584_v51 = vadd.f32 %v720_v49, %v504_v48  ;;  %v578_v52 = vpop.f32.mrb[9].mxu1 }
 0x38e   :  { %v579_v53 = vadd.f32 %v578_v52, %v499_v50 }
 0x38f   :  { %v588_v54 = vsub.f32 0.0, %v584_v51 }
 0x390   :  { %v587_v55 = vsub.f32 0.0, %v579_v53 }
 0x391   :  { %v591_v56 = vmul.f32 1.442695, %v588_v54 }
 0x392   :  { %v589_v57 = vmul.f32 1.442695, %v587_v55 }
 0x393   :  { %763 = vpow2.f32 %v591_v56 }
 0x394   :  { %765 = vpow2.f32 %v589_v57 }
 0x39d   :  { %v764_v58 = vpop.eup %763 }
 0x39e   :  { %v766_v59 = vpop.eup %765  ;;  %v594_v60 = vadd.f32 1.0, %v764_v58 }
 0x39f   :  { %v593_v61 = vadd.f32 1.0, %v766_v59 }
 0x3a0   :  { %767 = vrcp.f32 %v594_v60 }
 0x3a1   :  { %769 = vrcp.f32 %v593_v61 }
 0x3aa   :  { %v768_v62 = vpop.eup %767 }
 0x3ab   :  { %v770_v63 = vpop.eup %769  ;;  %598 = vst [vmem:[%s970_s9 + $0x8] sm:$0x7] %v768_v62 }
 0x3ac   :  { %597 = vst [vmem:[%s970_s9] sm:$0xff] %v770_v63 }

</bundles_post_ra>
